<compile_context>
chip_gen: v5e
topology: v5e:2x2
jax: 0.10.0
libtpu: 0.0.40
codegen_flags: <defaults>
</compile_context>

<pallas_src>
import math

import jax
import jax.numpy as jnp
from jax import lax
from jax.experimental import pallas as pl
from jax.experimental.pallas import tpu as pltpu

EMB_DIM = 64
POS_EMB_DIM = EMB_DIM // 4          # 16
HALF_DIM = POS_EMB_DIM // 2         # 8
MAX_PERIOD = 10000.0
DOWNSCALE_FREQ_SHIFT = 1.0
LOG_COEF = math.log(MAX_PERIOD) / (HALF_DIM - DOWNSCALE_FREQ_SHIFT)
HALF_PI = math.pi / 2.0

PAD_DIM = 128                       # lane-dense padded feature dim
# Packed-parameter row layout (all sublane offsets 8-aligned).
ROW_W1 = 0                          # [16, 128]   w1 zero-padded on cols 64:
ROW_B1 = 16                         # [1, 128]    rows 17..23 are padding
ROW_W2 = 24                         # [128, 128]  w2 zero-padded rows/cols 64:
ROW_B2 = 152                        # [1, 128]    rows 153..159 are padding
N_ROWS = 160

MAX_BATCH_TILE = 2048               # ~1 MB output block / grid step: well under VMEM


def pack_time_emb_params(w1, b1, w2, b2, *, dtype=jnp.bfloat16):
    """Pack Linear params ONCE into a single lane-dense [160, 128] buffer.

    w1: [16, 64] (stored [in, out] = PyTorch weight.T), b1: [64]
    w2: [64, 64] (stored [in, out]),                    b2: [64]

    Zero-pad invariant (correctness-critical): columns 64: of w1/b1/b2 and
    rows/cols 64: of w2 MUST stay exactly zero — guaranteed here because the
    buffer starts as zeros and only [:, :64] / [:64, :64] regions are written.
    That invariant makes cols 64: of every intermediate and of the kernel
    output exactly zero.  Default dtype bf16 halves the per-call parameter DMA
    and feeds the MXU its native bf16 path; accumulation stays f32 in-kernel.
    """
    p = jnp.zeros((N_ROWS, PAD_DIM), dtype)
    p = p.at[ROW_W1:ROW_W1 + POS_EMB_DIM, :EMB_DIM].set(w1.astype(dtype))
    p = p.at[ROW_B1, :EMB_DIM].set(b1.astype(dtype))
    p = p.at[ROW_W2:ROW_W2 + EMB_DIM, :EMB_DIM].set(w2.astype(dtype))
    p = p.at[ROW_B2, :EMB_DIM].set(b2.astype(dtype))
    return p


def time_emb_kernel(t_ref, p_ref, o_ref):
    t = t_ref[...]                                              # [TB, 1] f32

    # --- sinusoidal positional embedding, single sin pass ---
    #   cols 0..7  : sin(t * f_k)
    #   cols 8..15 : cos(t * f_k) = sin(t * f_k + pi/2)
    col = lax.broadcasted_iota(jnp.int32, (1, POS_EMB_DIM), 1)        # [1, 16]
    k = jnp.where(col < HALF_DIM, col, col - HALF_DIM).astype(jnp.float32)
    freqs = jnp.exp(-LOG_COEF * k)                                    # [1, 16]
    phase = jnp.where(col < HALF_DIM, 0.0, HALF_PI)                   # [1, 16]
    emb = jnp.sin(t * freqs + phase)                                  # [TB, 16] f32

    # --- static (free) 8-aligned views into the packed parameter block ---
    pdt = p_ref.dtype                                  # f32 or bf16
    w1 = p_ref[ROW_W1:ROW_W1 + POS_EMB_DIM, :]         # [16, 128]
    b1 = p_ref[ROW_B1:ROW_B1 + 1, :]                   # [1, 128]
    w2 = p_ref[ROW_W2:ROW_W2 + PAD_DIM, :]             # [128, 128]
    b2 = p_ref[ROW_B2:ROW_B2 + 1, :]                   # [1, 128]

    # --- Linear(16 -> 128pad) + SiLU; f32 accumulation, cols 64: stay 0 ---
    h = jnp.dot(emb.astype(pdt), w1, preferred_element_type=jnp.float32)
    h = h + b1.astype(jnp.float32)
    h = h * jax.nn.sigmoid(h)                                          # SWISH / SiLU

    # --- Linear(128pad -> 128pad); lane-dense unmasked store ---
    out = jnp.dot(h.astype(pdt), w2, preferred_element_type=jnp.float32)
    out = out + b2.astype(jnp.float32)
    o_ref[...] = out.astype(o_ref.dtype)


def _choose_batch_tile(batch):
    """Pick the batch tile: >= 2 grid steps for batched calls (v7x 2-TC sharding),
    8-row sublane granularity, capped at MAX_BATCH_TILE."""
    if batch <= 8:
        return 8                       # single grid step; launch-latency bound anyway
    half = -(-batch // 2)              # ceil(batch / 2)
    tb = ((half + 7) // 8) * 8         # round up to the 8-row sublane granule
    return min(tb, MAX_BATCH_TILE)


def time_embedding_padded(time_vec, packed_params, *, out_dtype=jnp.float32):
    """time_vec: [B] -> lane-dense [b_pad, 128] output (cols 64: exactly zero).

    Primary API: consumers that accept the padded layout avoid the extra XLA
    slice copy entirely.  `packed_params` comes from pack_time_emb_params.
    """
    B = time_vec.shape[0]
    tb = _choose_batch_tile(B)
    b_pad = -(-B // tb) * tb                           # multiple of the batch tile
    t2d = time_vec.reshape(B, 1).astype(jnp.float32)
    if b_pad != B:
        t2d = jnp.pad(t2d, ((0, b_pad - B), (0, 0)))

    param_bytes = N_ROWS * PAD_DIM * jnp.dtype(packed_params.dtype).itemsize
    out_bytes = b_pad * PAD_DIM * jnp.dtype(out_dtype).itemsize
    cost = pl.CostEstimate(
        flops=2 * b_pad * PAD_DIM * (POS_EMB_DIM + PAD_DIM) + 6 * b_pad * PAD_DIM,
        transcendentals=b_pad * (2 * POS_EMB_DIM + PAD_DIM),   # exp+sin (16) + sigmoid (128)
        bytes_accessed=4 * b_pad + param_bytes + out_bytes,
    )

    return pl.pallas_call(
        time_emb_kernel,
        out_shape=jax.ShapeDtypeStruct((b_pad, PAD_DIM), out_dtype),
        grid=(b_pad // tb,),
        in_specs=[
            pl.BlockSpec((tb, 1), lambda i: (i, 0),
                         memory_space=pltpu.MemorySpace.VMEM),
            pl.BlockSpec((N_ROWS, PAD_DIM), lambda i: (0, 0),
                         memory_space=pltpu.MemorySpace.VMEM),
        ],
        out_specs=pl.BlockSpec((tb, PAD_DIM), lambda i: (i, 0),
                               memory_space=pltpu.MemorySpace.VMEM),
        compiler_params=pltpu.CompilerParams(
            dimension_semantics=("parallel",)),
        cost_estimate=cost,
    )(t2d, packed_params)


def time_embedding(time_vec, packed_params, *, out_dtype=jnp.float32):
    """Convenience wrapper: [B] -> [B, EMB_DIM].

    Prefer time_embedding_padded + a consumer that accepts the padded [*, 128]
    layout; this slice is otherwise materialized by XLA as an extra copy.
    """
    B = time_vec.shape[0]
    return time_embedding_padded(time_vec, packed_params,
                                 out_dtype=out_dtype)[:B, :EMB_DIM]


def reference(time_vec, w1, b1, w2, b2):
    half = HALF_DIM
    freqs = jnp.exp(-LOG_COEF * jnp.arange(half, dtype=jnp.float32))
    arg = time_vec[:, None] * freqs[None, :]
    emb = jnp.concatenate([jnp.sin(arg), jnp.cos(arg)], axis=-1)
    h = emb @ w1 + b1
    h = h * jax.nn.sigmoid(h)
    return h @ w2 + b2


if __name__ == "__main__":
    key = jax.random.PRNGKey(0)
    k_t, k_w1, k_b1, k_w2, k_b2, k_t2 = jax.random.split(key, 6)

    # Deterministic synthetic parameters (Linear weights stored [in, out]).
    w1 = jax.random.normal(k_w1, (POS_EMB_DIM, EMB_DIM), jnp.float32) * 0.1
    b1 = jax.random.normal(k_b1, (EMB_DIM,), jnp.float32) * 0.1
    w2 = jax.random.normal(k_w2, (EMB_DIM, EMB_DIM), jnp.float32) * 0.1
    b2 = jax.random.normal(k_b2, (EMB_DIM,), jnp.float32) * 0.1

    # Pack once (model init).  bf16 is the production default; f32 for the
    # strict numerical check against the f32 reference.
    params_bf16 = pack_time_emb_params(w1, b1, w2, b2, dtype=jnp.bfloat16)
    params_f32 = pack_time_emb_params(w1, b1, w2, b2, dtype=jnp.float32)

    # --- per-step-sized call (B = 8, single grid step) ---
    B = 8
    t_small = jax.random.uniform(k_t, (B,), jnp.float32, minval=0.0, maxval=1000.0)
    ref_small = reference(t_small, w1, b1, w2, b2)

    out_f32 = jax.block_until_ready(time_embedding(t_small, params_f32))
    assert out_f32.shape == (B, EMB_DIM)
    # Tolerance 5e-4: the single-sin phase-offset embedding differs from a
    # direct cos() by at most ~1 ulp of the (arg + pi/2) f32 argument at t~1e3.
    assert jnp.allclose(out_f32, ref_small, atol=5e-4, rtol=5e-4), "f32 mismatch vs reference"

    out_bf16 = jax.block_until_ready(
        time_embedding(t_small, params_bf16, out_dtype=jnp.bfloat16))
    assert out_bf16.shape == (B, EMB_DIM) and out_bf16.dtype == jnp.bfloat16
    assert jnp.allclose(out_bf16.astype(jnp.float32), ref_small,
                        atol=5e-2, rtol=5e-2), "bf16 mismatch vs reference"

    # --- batched call (all diffusion timesteps at once): 2 grid steps, padded batch ---
    B2 = 50
    t_big = jax.random.uniform(k_t2, (B2,), jnp.float32, minval=0.0, maxval=1000.0)
    out_big = jax.block_until_ready(time_embedding(t_big, params_f32))
    ref_big = reference(t_big, w1, b1, w2, b2)
    assert out_big.shape == (B2, EMB_DIM)
    assert jnp.allclose(out_big, ref_big, atol=5e-4, rtol=5e-4), "batched mismatch vs reference"

    # Padded-layout API: cols 64: must be exactly zero (zero-pad invariant).
    out_pad = jax.block_until_ready(time_embedding_padded(t_big, params_f32))
    assert out_pad.shape[1] == PAD_DIM
    assert jnp.all(out_pad[:, EMB_DIM:] == 0.0), "padded columns not zero"

    print("KERNEL_OK")
</pallas_src>

<mosaic_0001>
module attributes {stable_mosaic.version = 11 : i64} {
  func.func @time_emb_kernel(%arg0: i32, %arg1: memref<8x1xf32, #tpu.memory_space<vmem>>, %arg2: memref<160x128xf32, #tpu.memory_space<vmem>>, %arg3: memref<8x128xf32, #tpu.memory_space<vmem>>) attributes {dimension_semantics = [#tpu.dimension_semantics<parallel>], iteration_bounds = array<i64: 1>, scalar_prefetch = 0 : i64, scratch_operands = 0 : i64, tpu.core_type = #tpu.core_type<tc>, window_params = [{transform_indices = @transform_0, window_bounds = array<i64: 8, 1>}, {pipeline_mode = #tpu.pipeline_mode<synchronous>, transform_indices = @transform_1, window_bounds = array<i64: 160, 128>}, {transform_indices = @transform_2, window_bounds = array<i64: 8, 128>}]} {
    %c0 = arith.constant 0 : index
    %c0_0 = arith.constant 0 : index
    %0 = vector.load %arg1[%c0, %c0_0] : memref<8x1xf32, #tpu.memory_space<vmem>>, vector<8x1xf32>
    %1 = tpu.iota {dimensions = array<i32: 1>} : vector<1x16xi32>
    %c8_i32 = arith.constant 8 : i32
    %2 = vector.broadcast %c8_i32 : i32 to vector<1x16xi32>
    %3 = arith.cmpi slt, %1, %2 : vector<1x16xi32>
    %c8_i32_1 = arith.constant 8 : i32
    %4 = vector.broadcast %c8_i32_1 : i32 to vector<1x16xi32>
    %5 = arith.subi %1, %4 : vector<1x16xi32>
    %6 = arith.select %3, %1, %5 : vector<1x16xi1>, vector<1x16xi32>
    %7 = arith.sitofp %6 : vector<1x16xi32> to vector<1x16xf32>
    %cst = arith.constant -1.31576288 : f32
    %8 = vector.broadcast %cst : f32 to vector<1x16xf32>
    %9 = arith.mulf %8, %7 : vector<1x16xf32>
    %10 = math.exp %9 : vector<1x16xf32>
    %c8_i32_2 = arith.constant 8 : i32
    %11 = vector.broadcast %c8_i32_2 : i32 to vector<1x16xi32>
    %12 = arith.cmpi slt, %1, %11 : vector<1x16xi32>
    %cst_3 = arith.constant 0.000000e+00 : f32
    %cst_4 = arith.constant 1.57079637 : f32
    %13 = vector.broadcast %cst_3 : f32 to vector<1x16xf32>
    %14 = vector.broadcast %cst_4 : f32 to vector<1x16xf32>
    %15 = arith.select %12, %13, %14 : vector<1x16xi1>, vector<1x16xf32>
    %16 = vector.broadcast %0 : vector<8x1xf32> to vector<8x16xf32>
    %17 = vector.broadcast %10 : vector<1x16xf32> to vector<8x16xf32>
    %18 = arith.mulf %16, %17 : vector<8x16xf32>
    %19 = vector.broadcast %15 : vector<1x16xf32> to vector<8x16xf32>
    %20 = arith.addf %18, %19 : vector<8x16xf32>
    %21 = math.sin %20 : vector<8x16xf32>
    %c0_5 = arith.constant 0 : index
    %c0_6 = arith.constant 0 : index
    %22 = vector.load %arg2[%c0_5, %c0_6] : memref<160x128xf32, #tpu.memory_space<vmem>>, vector<16x128xf32>
    %c16 = arith.constant 16 : index
    %c0_7 = arith.constant 0 : index
    %23 = vector.load %arg2[%c16, %c0_7] : memref<160x128xf32, #tpu.memory_space<vmem>>, vector<1x128xf32>
    %c24 = arith.constant 24 : index
    %c0_8 = arith.constant 0 : index
    %24 = vector.load %arg2[%c24, %c0_8] : memref<160x128xf32, #tpu.memory_space<vmem>>, vector<128x128xf32>
    %c152 = arith.constant 152 : index
    %c0_9 = arith.constant 0 : index
    %25 = vector.load %arg2[%c152, %c0_9] : memref<160x128xf32, #tpu.memory_space<vmem>>, vector<1x128xf32>
    %cst_10 = arith.constant dense<0.000000e+00> : vector<8x128xf32>
    %26 = tpu.matmul %21, %22, %cst_10 {dimension_numbers = #tpu.dot_dimension_numbers<[1], [0], [0], [1], [0, 0, 1, 1], [], []>} : vector<8x16xf32>, vector<16x128xf32>, vector<8x128xf32> -> vector<8x128xf32>
    %27 = vector.broadcast %23 : vector<1x128xf32> to vector<8x128xf32>
    %28 = arith.addf %26, %27 : vector<8x128xf32>
    %29 = arith.negf %28 : vector<8x128xf32>
    %30 = math.exp %29 : vector<8x128xf32>
    %cst_11 = arith.constant 1.000000e+00 : f32
    %31 = vector.broadcast %cst_11 : f32 to vector<8x128xf32>
    %32 = arith.addf %31, %30 : vector<8x128xf32>
    %33 = arith.divf %31, %32 : vector<8x128xf32>
    %34 = arith.mulf %28, %33 : vector<8x128xf32>
    %cst_12 = arith.constant dense<0.000000e+00> : vector<8x128xf32>
    %35 = tpu.matmul %34, %24, %cst_12 {dimension_numbers = #tpu.dot_dimension_numbers<[1], [0], [0], [1], [0, 0, 1, 1], [], []>} : vector<8x128xf32>, vector<128x128xf32>, vector<8x128xf32> -> vector<8x128xf32>
    %36 = vector.broadcast %25 : vector<1x128xf32> to vector<8x128xf32>
    %37 = arith.addf %35, %36 : vector<8x128xf32>
    %c0_13 = arith.constant 0 : index
    %c0_14 = arith.constant 0 : index
    %38 = vector.load %arg3[%c0_13, %c0_14] : memref<8x128xf32, #tpu.memory_space<vmem>>, vector<8x128xf32>
    tpu.vector_store %arg3[%c0_13, %c0_14], %37 {strides = array<i32>} : memref<8x128xf32, #tpu.memory_space<vmem>>, vector<8x128xf32>,
    return
  }
  func.func @transform_0(%arg0: i32) -> (i32, i32) {
    %c0_i32 = arith.constant 0 : i32
    %c0_i32_0 = arith.constant 0 : i32
    return %arg0, %c0_i32 : i32, i32
  }
  func.func @transform_1(%arg0: i32) -> (i32, i32) {
    %c0_i32 = arith.constant 0 : i32
    %c0_i32_0 = arith.constant 0 : i32
    %c0_i32_1 = arith.constant 0 : i32
    return %c0_i32, %c0_i32_0 : i32, i32
  }
  func.func @transform_2(%arg0: i32) -> (i32, i32) {
    %c0_i32 = arith.constant 0 : i32
    %c0_i32_0 = arith.constant 0 : i32
    return %arg0, %c0_i32 : i32, i32
  }
}

</mosaic_0001>

<bundles_post_ra>
// kernel: tpu_custom_call.1
= control target key start
LH: loop header
LB: loop body
LE: loop exit
PB: predicated region body
PF: predicated region fallthrough
CT: control target
= control target key end

     0   :  { %7 = vsyncpa [#allocation3], 0  ;;  %s479_s0 = inlined_call_operand.vmem [shape: f32[8,1], index: 0, kind: input, shape index: {}]   ;;  %s480_s1 = inlined_call_operand.hbm [shape: f32[160,128], index: 1, kind: input, shape index: {}]   ;;  %s481_s2 = inlined_call_operand.hbm [shape: f32[8,128], index: 2, kind: output, shape index: {}]  }
   0x1   :  { %8 = vsyncpa [#allocation4], 0  ;;  %s15_s11 = sshll.u32 %s480_s1, 4  ;;  %s384_s12 = smov [#allocation2]   ;;  %s16_s11 = int_to_ptr.hbm [resolvable:$true] %s15_s11 }
   0x2   :  { %s17_s13 = sshll.u32 %s384_s12, 4  ;;  %s385_s14 = smov 128   ;;  %s18_s13 = int_to_ptr.vmem [resolvable:$true] %s17_s13 }
   0x3   :  { %s386_s15 = smov 8  }
   0x4   :  { %23 = dma.hbm_to_vmem [thread:$0]  %s16_s11, 2560, %s18_s13, [#allocation3], %s385_s14, %s385_s14, %s386_s15  }
   0x5   :  { %380 = dma.done.wait [#allocation3], 2560  }
   0x6   :  { %381 = vsyncadd [#allocation3], 4294964736  ;;  %v387_v0 = vmov 0   ;;  %v28_v1 = vld [vmem:[%s479_s0] sm:$0xff]  ;;  %v29_v2 = vlaneseq  ;;  %v202_v9 = vld [vmem:[#allocation2 + $0x8] sm:$0xff]  ;;  %s395_s0 = smov [#allocation5]  }
   0x7   :  { %323 = vset.pattern.permute.xlu0 %v387_v0  ;;  %v201_v10 = vld [vmem:[#allocation2] sm:$0xff]  ;;  %240 = vmatpush.msra.mxu0 %v202_v9  ;;  %v388_v12 = vmov 1.5707964   ;;  %v389_v28 = vmov 2102212464   ;;  %s293_s1 = sshll.u32 %s395_s0, 4  ;;  %s294_s1 = int_to_ptr.vmem [resolvable:$true] %s293_s1 }
   0x8   :  { %41 = vperm.xlu0 %323, %v28_v1   ;;  %v30_v3 = vand.u32 127, %v29_v2  ;;  %v390_v30 = vmov 920167782   ;;  %v391_v33 = vmov 1326507024   ;;  %s295_s20 = sshll.u32 %s481_s2, 4  ;;  %s296_s20 = int_to_ptr.hbm [resolvable:$true] %s295_s20 }
   0x9   :  { %241 = vmatpush.msra.mxu0 %v201_v10  ;;  %v392_v35 = vmov 683565275   ;;  %v393_v37 = vmov 2475754826   ;;  %v394_v40 = vmov 2131351028  }
   0xa   :  { %v305_v4 = vadd.s32 4294967288, %v30_v3  ;;  %vm31_vm0 = vcmp.lt.s32.totalorder %v30_v3, 8 }
   0xb   :  { %v38_v13 = vsel %vm31_vm0, 0.0, %v388_v12 }
   0xc   :  { %v33_v5 = vsel %vm31_vm0, %v30_v3, %v305_v4 }
   0xd   :  { %v34_v6 = vcvt.s32.f32 %v33_v5 }
   0xf   :  { %v35_v7 = vmul.f32 -1.3157629, %v34_v6 }
  0x11   :  { %v36_v8 = vmul.f32 1.442695, %v35_v7 }
  0x13   :  { %326 = vpow2.f32 %v36_v8 }
  0x19   :  { %v327_v11 = vpop.eup %326 }
  0x7a   :  { %v42_v14 = vpop.permute.xlu0 %41 }
  0x7b   :  { %v44_v15 = vmul.f32 %v327_v11, %v42_v14 }
  0x7d   :  { %v418_v16 = vadd.f32 %v44_v15, %v38_v13 }
  0x7f   :  { %v49_v17 = vand.u32 2139095040, %v418_v16  ;;  %v46_v20 = vand.u32 2147483647, %v418_v16  ;;  %vm48_vm13 = vcmp.lt.s32.totalorder %v418_v16, 0 }
  0x81   :  { %v50_v18 = vshrl.u32 %v49_v17, 23  ;;  %v53_v22 = vand.u32 8388607, %v46_v20  ;;  %vm47_vm14 = vcmp.le.f32.partialorder %v46_v20, 0.7853982 }
  0x83   :  { %v306_v19 = vadd.s32 4294967169, %v50_v18  ;;  %v54_v26 = vor.u32 8388608, %v53_v22 }
  0x85   :  { %v56_v21 = vadd.s32 1, %v306_v19  ;;  %v433_v47 = vshll.u32 %v54_v26, 8 }
  0x87   :  { %vm57_vm1 = vcmp.gt.s32.totalorder %v56_v21, 0  ;;  %v95_v57 = vand.u32 65535, %v433_v47  ;;  %v96_v59 = vshrl.u32 %v433_v47, 16 }
  0x88   :  { %v58_v23 = vsel %vm57_vm1, %v56_v21, 0 }
  0x89   :  { %v60_v24 = vand.u32 31, %v58_v23  ;;  %v426_v27 = vshrl.u32 %v58_v23, 5 }
  0x8b   :  { %v424_v25 = vsub.s32 32, %v60_v24  ;;  %v72_v29 = vshll.u32 %v389_v28, %v60_v24  ;;  %v75_v31 = vshll.u32 %v390_v30, %v60_v24  ;;  %v63_v36 = vshll.u32 %v392_v35, %v60_v24 }
  0x8c   :  { %v66_v39 = vshll.u32 %v393_v37, %v60_v24  ;;  %v69_v42 = vshll.u32 %v394_v40, %v60_v24  ;;  %vm81_vm2 = vcmp.lt.s32.totalorder %v426_v27, 4  ;;  %vm78_vm3 = vcmp.lt.s32.totalorder %v426_v27, 1 }
  0x8d   :  { %v73_v32 = vshrl.u32 %v390_v30, %v424_v25  ;;  %v76_v34 = vshrl.u32 %v391_v33, %v424_v25  ;;  %v64_v38 = vshrl.u32 %v393_v37, %v424_v25  ;;  %v67_v41 = vshrl.u32 %v394_v40, %v424_v25 }
  0x8e   :  { %v70_v43 = vshrl.u32 %v389_v28, %v424_v25  ;;  %vm80_vm4 = vcmp.lt.s32.totalorder %v426_v27, 3  ;;  %vm79_vm5 = vcmp.lt.s32.totalorder %v426_v27, 2  ;;  %v62_v21 = vshrl.u32 %v392_v35, %v424_v25 }
  0x8f   :  { %v74_v44 = vor.u32 %v73_v32, %v72_v29  ;;  %v77_v45 = vor.u32 %v76_v34, %v75_v31  ;;  %v65_v46 = vor.u32 %v64_v38, %v63_v36  ;;  %v68_v48 = vor.u32 %v67_v41, %v66_v39 }
  0x90   :  { %v71_v49 = vor.u32 %v70_v43, %v69_v42 }
  0x91   :  { %v87_v50 = vsel %vm81_vm2, %v74_v44, 920167782  ;;  %v91_v51 = vsel %vm81_vm2, %v77_v45, 1326507024  ;;  %v86_v52 = vsel %vm78_vm3, %v65_v46, %v68_v48  ;;  %v82_v29 = vsel %vm78_vm3, %v62_v21, %v65_v46 }
  0x92   :  { %v88_v53 = vsel %vm80_vm4, %v71_v49, %v87_v50  ;;  %v90_v54 = vsel %vm78_vm3, %v68_v48, %v71_v49  ;;  %v92_v56 = vsel %vm80_vm4, %v74_v44, %v91_v51  ;;  %v83_v17 = vsel %vm81_vm2, %v71_v49, 2102212464 }
  0x93   :  { %v89_v55 = vsel %vm79_vm5, %v86_v52, %v88_v53  ;;  %v93_v58 = vsel %vm79_vm5, %v90_v54, %v92_v56  ;;  %v84_v30 = vsel %vm80_vm4, %v68_v48, %v83_v17  ;;  %vm222_vm2 = vcmask 130048  }
  0x94   :  { %v119_v60 = vand.u32 65535, %v89_v55  ;;  %v120_v61 = vshrl.u32 %v89_v55, 16  ;;  %v97_v62 = vand.u32 65535, %v93_v58  ;;  %v98_v63 = vshrl.u32 %v93_v58, 16 }
  0x95   :  { %v85_v35 = vsel %vm79_vm5, %v82_v29, %v84_v30  ;;  %vm189_vm3 = vweird.f32 %v418_v16 }
  0x96   :  { %v122_v1 = vmul.u32 %v120_v61, %v95_v57  ;;  %v123_v2 = vmul.u32 %v119_v60, %v96_v59  ;;  %v100_v3 = vmul.u32 %v98_v63, %v95_v57  ;;  %v101_v4 = vmul.u32 %v97_v62, %v96_v59 }
  0x97   :  { %v121_v5 = vmul.u32 %v119_v60, %v95_v57  ;;  %v99_v7 = vmul.u32 %v97_v62, %v95_v57  ;;  %v124_v9 = vmul.u32 %v120_v61, %v96_v59  ;;  %v102_v10 = vmul.u32 %v98_v63, %v96_v59 }
  0x98   :  { %v125_v6 = vshll.u32 %v122_v1, 16  ;;  %v103_v8 = vshll.u32 %v100_v3, 16  ;;  %v127_v11 = vshll.u32 %v123_v2, 16  ;;  %v105_v13 = vshll.u32 %v101_v4, 16 }
  0x99   :  { %v126_v26 = vshrl.u32 %v122_v1, 16  ;;  %v104_v31 = vshrl.u32 %v100_v3, 16  ;;  %v128_v33 = vshrl.u32 %v123_v2, 16  ;;  %v106_v36 = vshrl.u32 %v101_v4, 16 }
  0x9a   :  { %vm129_vm6 = vc.u32 %v121_v5, %v125_v6  ;;  %v131_v12 = vadd.s32 %v125_v6, %v121_v5  ;;  %vm107_vm7 = vc.u32 %v99_v7, %v103_v8  ;;  %v109_v14 = vadd.s32 %v103_v8, %v99_v7 }
  0x9b   :  { %v130_v15 = vsel %vm129_vm6, 1, %v387_v0  ;;  %v108_v18 = vsel %vm107_vm7, 1, %v387_v0  ;;  %v139_v40 = vmul.u32 %v433_v47, %v85_v35  ;;  %v213_v35 = vld [vmem:[#allocation2 + $0x60] sm:$0xff] }
  0x9c   :  { %v132_v19 = vadd.s32 %v130_v15, %v124_v9  ;;  %vm133_vm8 = vc.u32 %v131_v12, %v127_v11  ;;  %v110_v22 = vadd.s32 %v108_v18, %v102_v10  ;;  %vm111_vm9 = vc.u32 %v109_v14, %v105_v13 }
  0x9d   :  { %v134_v23 = vsel %vm133_vm8, 1, %v387_v0  ;;  %v112_v24 = vsel %vm111_vm9, 1, %v387_v0  ;;  %v135_v0 = vadd.s32 %v131_v12, %v127_v11 }
  0x9e   :  { %v136_v28 = vadd.s32 %v134_v23, %v132_v19  ;;  %v114_v32 = vadd.s32 %v112_v24, %v110_v22 }
  0xa0   :  { %v137_v34 = vadd.s32 %v136_v28, %v126_v26  ;;  %v115_v25 = vadd.s32 %v114_v32, %v104_v31  ;;  %v219_v31 = vld [vmem:[#allocation2 + $0x90] sm:$0xff]  ;;  %v218_v32 = vld [vmem:[#allocation2 + $0x88] sm:$0xff] }
  0xa1   :  { %267 = vmatpush.msra.mxu1 %v219_v31 }
  0xa2   :  { %v138_v37 = vadd.s32 %v137_v34, %v128_v33  ;;  %v116_v38 = vadd.s32 %v115_v25, %v106_v36  ;;  %v217_v33 = vld [vmem:[#allocation2 + $0x80] sm:$0xff]  ;;  %v216_v34 = vld [vmem:[#allocation2 + $0x78] sm:$0xff]  ;;  %v215_v36 = vld [vmem:[#allocation2 + $0x70] sm:$0xff] }
  0xa3   :  { %268 = vmatpush.msra.mxu1 %v218_v32  ;;  %v214_v25 = vld [vmem:[#allocation2 + $0x68] sm:$0xff] }
  0xa4   :  { %v142_v39 = vadd.s32 1, %v138_v37  ;;  %vm141_vm10 = vc.u32 %v116_v38, %v135_v0  ;;  %v140_v52 = vadd.s32 %v135_v0, %v116_v38  ;;  %v211_v38 = vld [vmem:[#allocation2 + $0x50] sm:$0xff]  ;;  %v209_v0 = vld [vmem:[#allocation2 + $0x40] sm:$0xff] }
  0xa5   :  { %269 = vmatpush.msra.mxu1 %v217_v33 }
  0xa6   :  { %v143_v41 = vsel %vm141_vm10, %v142_v39, %v138_v37  ;;  %v212_v37 = vld [vmem:[#allocation2 + $0x58] sm:$0xff] }
  0xa7   :  { %v144_v42 = vadd.s32 %v143_v41, %v139_v40  ;;  %270 = vmatpush.msra.mxu1 %v216_v34  ;;  %v208_v39 = vld [vmem:[#allocation2 + $0x38] sm:$0xff]  ;;  %v207_v40 = vld [vmem:[#allocation2 + $0x30] sm:$0xff]  ;;  %v206_v41 = vld [vmem:[#allocation2 + $0x28] sm:$0xff] }
  0xa9   :  { %v145_v43 = vadd.s32 536870912, %v144_v42  ;;  %271 = vmatpush.msra.mxu1 %v215_v36 }
  0xab   :  { %v146_v44 = vshrl.u32 %v145_v43, 30  ;;  %272 = vmatpush.msra.mxu1 %v214_v25  ;;  %v205_v43 = vld [vmem:[#allocation2 + $0x20] sm:$0xff] }
  0xad   :  { %v147_v45 = vshll.u32 %v146_v44, 30  ;;  %v170_v2 = vsub.s32 4, %v146_v44  ;;  %273 = vmatpush.msra.mxu1 %v213_v35 }
  0xaf   :  { %v148_v46 = vsub.s32 %v144_v42, %v147_v45  ;;  %v171_v7 = vsel %vm48_vm13, %v170_v2, %v146_v44  ;;  %274 = vmatpush.msra.mxu1 %v212_v37  ;;  %v324_v42 = vld [vmem:[#allocation2 + $0x10] ss:$0 sm:$0xff]  ;;  %v204_v45 = vld [vmem:[#allocation2 + $0x18] sm:$0xff] }
  0xb0   :  { %v173_v10 = vsel %vm47_vm14, 0, %v171_v7 }
  0xb1   :  { %vm149_vm11 = vcmp.lt.s32.totalorder %v148_v46, 0  ;;  %v150_v48 = vsub.s32 0, %v148_v46  ;;  %v190_v15 = vadd.s32 3, %v173_v10  ;;  %275 = vmatpush.msra.mxu1 %v211_v38 }
  0xb3   :  { %v151_v49 = vsel %vm149_vm11, %v150_v48, %v148_v46  ;;  %v191_v21 = vand.u32 3, %v190_v15 }
  0xb4   :  { %v152_v50 = vclz %v151_v49 }
  0xb5   :  { %vm193_vm15 = vcmp.eq.s32.totalorder %v191_v21, 0  ;;  %vm196_vm0 = vcmp.eq.s32.totalorder %v191_v21, 2  ;;  %vm192_vm1 = vcmp.lt.s32.totalorder %v191_v21, 2 }
  0xb6   :  { %v307_v51 = vadd.s32 4294967294, %v152_v50 }
  0xb8   :  { %vm308_vm12 = vcmp.lt.s32.totalorder %v307_v51, 0 }
  0xb9   :  { %v155_v27 = vsel %vm308_vm12, 0, %v307_v51 }
  0xba   :  { %v156_v53 = vsub.s32 32, %v155_v27  ;;  %v160_v54 = vsub.s32 4294967266, %v155_v27  ;;  %v157_v55 = vshll.u32 %v148_v46, %v155_v27 }
  0xbc   :  { %v158_v56 = vshrl.u32 %v140_v52, %v156_v53  ;;  %v161_v47 = vadd.s32 127, %v160_v54 }
  0xbe   :  { %v159_v57 = vor.u32 %v158_v56, %v157_v55  ;;  %v162_v58 = vshll.u32 %v161_v47, 23 }
  0xc0   :  { %v163_v59 = vor.u32 4788187, %v162_v58  ;;  %v166_v61 = vcvt.s32.f32 %v159_v57 }
  0xc2   :  { %v164_v60 = vand.u32 2147483647, %v163_v59 }
  0xc4   :  { %v167_v62 = vmul.f32 %v166_v61, %v164_v60  ;;  %v325_v60 = vld [vmem:[#allocation2 + $0x98] ss:$0 sm:$0xff] }
  0xc6   :  { %v168_v63 = vxor.u32 2147483648, %v167_v62 }
  0xc8   :  { %v169_v1 = vsel %vm48_vm13, %v168_v63, %v167_v62 }
  0xc9   :  { %v172_v3 = vsel %vm47_vm14, %v418_v16, %v169_v1  ;;  %v210_v16 = vld [vmem:[#allocation2 + $0x48] sm:$0xff] }
  0xca   :  { %v174_v4 = vmul.f32 %v172_v3, %v172_v3  ;;  %276 = vmatpush.msra.mxu1 %v210_v16 }
  0xcc   :  { %v175_v5 = vmul.f32 -0.001358992, %v174_v4  ;;  %v182_v6 = vmul.f32 -0.00019511016, %v174_v4  ;;  %277 = vmatpush.msra.mxu1 %v209_v0 }
  0xce   :  { %v176_v8 = vadd.f32 0.041655596, %v175_v5  ;;  %v183_v9 = vadd.f32 0.008332121, %v182_v6  ;;  %278 = vmatpush.msra.mxu1 %v208_v39 }
  0xd0   :  { %v177_v11 = vmul.f32 %v176_v8, %v174_v4  ;;  %v184_v12 = vmul.f32 %v183_v9, %v174_v4  ;;  %279 = vmatpush.msra.mxu1 %v207_v40 }
  0xd2   :  { %v178_v13 = vadd.f32 -0.4999988, %v177_v11  ;;  %v185_v14 = vadd.f32 -0.16666654, %v184_v12  ;;  %280 = vmatpush.msra.mxu1 %v206_v41 }
  0xd4   :  { %v179_v17 = vmul.f32 %v178_v13, %v174_v4  ;;  %v186_v18 = vmul.f32 %v185_v14, %v174_v4  ;;  %281 = vmatpush.msra.mxu1 %v205_v43 }
  0xd6   :  { %v180_v19 = vadd.f32 1.0, %v179_v17  ;;  %v187_v20 = vadd.f32 1.0, %v186_v18  ;;  %282 = vmatpush.msra.mxu1 %v204_v45 }
  0xd8   :  { %v188_v22 = vmul.f32 %v187_v20, %v172_v3  ;;  %v197_v23 = vxor.u32 2147483648, %v180_v19 }
  0xda   :  { %v194_v24 = vxor.u32 2147483648, %v188_v22  ;;  %v198_v28 = vsel %vm196_vm0, %v197_v23, %v188_v22 }
  0xdc   :  { %v195_v26 = vsel %vm193_vm15, %v180_v19, %v194_v24 }
  0xdd   :  { %v199_v29 = vsel %vm192_vm1, %v195_v26, %v198_v28 }
  0xde   :  { %v200_v30 = vsel %vm189_vm3, nan, %v199_v29 }
  0xdf   :  { %309 = vmatmul.msk.f32.vlgmr.msra.gmra.mxu0 %vm222_vm2, %v200_v30 }
 0x15c   :  { %v243_v44 = vpop.f32.mrf.mxu0 }
 0x15d   :  { %v244_v46 = vadd.f32 %v324_v42, %v243_v44 }
 0x15f   :  { %v310_v48 = vmul.f32 -1.442695, %v244_v46 }
 0x161   :  { %328 = vpow2.f32 %v310_v48 }
 0x167   :  { %v329_v49 = vpop.eup %328 }
 0x168   :  { %v249_v50 = vadd.f32 1.0, %v329_v49 }
 0x16a   :  { %330 = vrcp.f32 %v249_v50  ;;  %v261_v53 = vand.u32 2147483648, %v249_v50  ;;  %v259_v55 = vand.u32 2147483647, %v249_v50  ;;  %vm255_vm5 = vweird.f32 %v249_v50 }
 0x16c   :  { %v262_v47 = vor.u32 1.1754944e-38, %v261_v53  ;;  %vm260_vm7 = vcmp.eq.f32.partialorder %v259_v55, 8.507059e+37 }
 0x170   :  { %v331_v51 = vpop.eup %330 }
 0x171   :  { %v251_v27 = vmul.f32 %v331_v51, %v249_v50  ;;  %vm256_vm4 = vweird.f32 %v331_v51 }
 0x172   :  { %vm257_vm6 = vmor %vm255_vm5, %vm256_vm4 }
 0x173   :  { %v252_v52 = vsub.f32 1.0, %v251_v27 }
 0x175   :  { %v253_v54 = vmul.f32 %v331_v51, %v252_v52 }
 0x177   :  { %v254_v56 = vadd.f32 %v331_v51, %v253_v54 }
 0x179   :  { %v258_v57 = vsel %vm257_vm6, %v331_v51, %v254_v56 }
 0x17a   :  { %v263_v58 = vsel %vm260_vm7, %v262_v47, %v258_v57 }
 0x17b   :  { %v265_v59 = vmul.f32 %v263_v58, %v244_v46 }
 0x17d   :  { %283 = vmatmul.f32.vlgmr.msra.gmra.mxu1 %v265_v59 }
 0x1fa   :  { %v284_v61 = vpop.f32.mrf.mxu1 }
 0x1fb   :  { %v285_v62 = vadd.f32 %v325_v60, %v284_v61 }
 0x1fd   :  { %287 = vst [vmem:[#allocation5] sm:$0xff] %v285_v62 }
 0x1fe   :  { %298 = dma.vmem_to_hbm [thread:$0]  %s294_s1, 128, %s296_s20, [#allocation4]  }
 0x1ff   :  { %382 = dma.done.wait [#allocation4], 128  }
 0x200   :  { %383 = vsyncadd [#allocation4], 4294967168 }
 0x201   :  { %303 = vsyncpa [#allocation3], 1 }
 0x202   :  { %304 = vsyncpa [#allocation4], 1 }

</bundles_post_ra>
